<compile_context>
chip_gen: v6e
topology: v6e:2x2x1
jax: 0.10.0
libtpu: 0.0.40
codegen_flags: <defaults>
</compile_context>

<pallas_src>
import functools

import jax
import jax.numpy as jnp
from jax.experimental import pallas as pl
from jax.experimental.pallas import tpu as pltpu


def _encoder_kernel(patch_ref, w_ref, b_ref, out_ref, *, inv_hw):
    # patch_ref: (B_t, hw_tile, CKKp) bf16 -- one HW tile of B_t images' patches
    # w_ref    : (CKKp, F)            bf16 -- flattened conv weights
    # b_ref    : (1, F)               f32  -- conv bias
    # out_ref  : (B_t, F)             f32  -- pooled features (resident over t)
    t = pl.program_id(1)

    @pl.when(t == 0)
    def _():
        out_ref[...] = jnp.zeros_like(out_ref)

    bt = patch_ref.shape[0]
    partials = []
    for b in range(bt):  # small static unroll over images in this block
        h = jnp.dot(patch_ref[b], w_ref[...],
                    preferred_element_type=jnp.float32)      # MXU, f32 acc
        h = jnp.maximum(h + b_ref[...], 0.0)                  # bias + ReLU (f32)
        partials.append(jnp.sum(h, axis=0, keepdims=True))    # (1, F) pool sum
    out_ref[...] += jnp.concatenate(partials, axis=0)         # (B_t, F)

    @pl.when(t == pl.num_programs(1) - 1)
    def _():
        out_ref[...] *= inv_hw                                 # finalize mean pool


def _build_patches(x, mean, std, k, ckk_pad):
    # x: (N, C, H, W) f32.  Normalize (f32, exact) -> NHWC -> zero-pad ->
    # concat 9 shifted views (+ zero pad chunk to ckk_pad) -> bf16.
    # Column order: (dh*K + dw)*C + c.
    n, c, h, w = x.shape
    pad = k // 2
    xn = (x - mean.reshape(1, c, 1, 1)) / std.reshape(1, c, 1, 1)
    xn = jnp.transpose(xn, (0, 2, 3, 1))                       # (N, H, W, C)
    xp = jnp.pad(xn, ((0, 0), (pad, pad), (pad, pad), (0, 0)))  # zero pad post-norm
    taps = [xp[:, dh:dh + h, dw:dw + w, :]
            for dh in range(k) for dw in range(k)]
    ckk = c * k * k
    if ckk_pad > ckk:
        taps.append(jnp.zeros((n, h, w, ckk_pad - ckk), xn.dtype))
    patches = jnp.concatenate(taps, axis=-1)                   # (N, H, W, ckk_pad)
    return patches.reshape(n, h * w, ckk_pad).astype(jnp.bfloat16)


def _pick_tiles(n, hw, target_rows):
    """Pick (B_t, hw_tile): big blocks, multiple-of-8 sublanes, divisor-safe."""
    if hw <= target_rows:
        hw_tile = hw                                            # full image(s) per step
        cap = max(1, target_rows // hw)
        if cap >= n:
            return n, hw_tile
        best_any, best_8 = 1, None
        for d in range(1, cap + 1):                             # divisor of N
            if n % d == 0:
                best_any = d
                if d % 8 == 0:
                    best_8 = d
        return (best_8 or best_any), hw_tile
    # Large image: one image per block, largest multiple-of-8 divisor of HW
    # under the row budget (avoids the old single-block / non-8 fallback trap).
    best = None
    for d in range(8, target_rows + 1, 8):
        if hw % d == 0:
            best = d
    if best is None:
        # TODO(synk): pad HW to a tile multiple and mask padded rows in-kernel
        # (zero patch rows still give ReLU(bias) > 0, so masking is required).
        best = hw
    return 1, best


def robust_imagenet_encoder_forward(x, params, *, target_rows=4096):
    """x: (N, C, H, W) in [0, 1].  Returns features (N, F) in float32."""
    w_pt, b, mean, std, k = (params["w_pt"], params["b"], params["mean"],
                             params["std"], params["k"])
    n, c, h, wd = x.shape
    f = w_pt.shape[0]
    ckk = c * k * k
    hw = h * wd
    ckk_pad = ((ckk + 31) // 32) * 32                           # 27 -> 32 for bf16 packing

    # Weight columns match the patch column order (dh*K + dw)*C + c.
    w_col = jnp.transpose(w_pt, (2, 3, 1, 0)).reshape(ckk, f).astype(jnp.float32)
    w_col = jnp.pad(w_col, ((0, ckk_pad - ckk), (0, 0)))
    w_bf = w_col.astype(jnp.bfloat16)
    bias = b.reshape(1, f).astype(jnp.float32)

    patches_bf = _build_patches(x, mean, std, k, ckk_pad)       # (N, HW, ckk_pad) bf16

    bt, hw_tile = _pick_tiles(n, hw, target_rows)
    n_b = n // bt
    n_t = hw // hw_tile

    kernel = functools.partial(_encoder_kernel, inv_hw=1.0 / hw)
    cost = pl.CostEstimate(
        flops=2 * n * hw * ckk * f,                             # true 27-term contraction
        transcendentals=0,
        bytes_accessed=(n * hw * ckk_pad * 2 + ckk_pad * f * 2
                        + f * 4 + n * f * 4),
    )

    out = pl.pallas_call(
        kernel,
        out_shape=jax.ShapeDtypeStruct((n, f), jnp.float32),
        grid_spec=pltpu.PrefetchScalarGridSpec(
            num_scalar_prefetch=0,
            grid=(n_b, n_t),                                    # HW reduction axis last
            in_specs=[
                pl.BlockSpec((bt, hw_tile, ckk_pad), lambda i, t: (i, t, 0)),
                pl.BlockSpec((ckk_pad, f), lambda i, t: (0, 0)),
                pl.BlockSpec((1, f), lambda i, t: (0, 0)),
            ],
            out_specs=pl.BlockSpec((bt, f), lambda i, t: (i, 0)),
        ),
        compiler_params=pltpu.CompilerParams(
            dimension_semantics=("parallel", "arbitrary"),
            # Explicit budget (review): fits v7x's 64 MiB physical VMEM with
            # headroom, raises v5e's 16 MiB scoped default; the chosen tiles
            # (~4096 rows: ~2 MiB double-buffered patches + ~2 MiB f32
            # intermediate) use only a fraction of it.
            vmem_limit_bytes=32 * 1024 * 1024),
        cost_estimate=cost,
    )(patches_bf, w_bf, bias)

    return out


def _reference_forward(x, params):
    # Pure-JAX f32 reference matching the PyTorch module:
    # normalize -> zero-pad -> 3x3 conv + bias -> ReLU -> global average pool.
    w_pt, b, mean, std, k = (params["w_pt"], params["b"], params["mean"],
                             params["std"], params["k"])
    n, c, h, wd = x.shape
    f = w_pt.shape[0]
    pad = k // 2
    xn = (x - mean.reshape(1, c, 1, 1)) / std.reshape(1, c, 1, 1)
    xn = jnp.transpose(xn, (0, 2, 3, 1))
    xp = jnp.pad(xn, ((0, 0), (pad, pad), (pad, pad), (0, 0)))
    taps = [xp[:, dh:dh + h, dw:dw + wd, :]
            for dh in range(k) for dw in range(k)]
    patches = jnp.concatenate(taps, axis=-1).reshape(n, h * wd, k * k * c)
    w_col = jnp.transpose(w_pt, (2, 3, 1, 0)).reshape(k * k * c, f)
    hcv = jnp.einsum("npk,kf->npf", patches, w_col) + b.reshape(1, 1, f)
    hcv = jnp.maximum(hcv, 0.0)
    return jnp.mean(hcv, axis=1)                                # (N, F)


def make_params(key, c=3, k=3, f=128):
    kw, kb = jax.random.split(key)
    # PyTorch conv weight layout (F, C, K, K).
    w_pt = jax.random.normal(kw, (f, c, k, k), jnp.float32) * 0.1
    b = jax.random.normal(kb, (f,), jnp.float32) * 0.01
    # ImageNet-style normalization constants.
    mean = jnp.array([0.485, 0.456, 0.406], jnp.float32)[:c]
    std = jnp.array([0.229, 0.224, 0.225], jnp.float32)[:c]
    if c > 3:
        mean = jnp.full((c,), 0.5, jnp.float32)
        std = jnp.full((c,), 0.25, jnp.float32)
    return {"w_pt": w_pt, "b": b, "mean": mean, "std": std, "k": k}


if __name__ == "__main__":
    key = jax.random.PRNGKey(0)
    kx, kp = jax.random.split(key)

    # Small shapes: batch=2, RGB channels=3 (ImageNet images), spatial=16x16.
    N, C, H, W = 2, 3, 16, 16
    F = 128  # feature dim D

    x = jax.random.uniform(kx, (N, C, H, W), jnp.float32)       # range [0, 1]
    params = make_params(kp, c=C, k=3, f=F)

    feats = robust_imagenet_encoder_forward(x, params)
    feats = jax.block_until_ready(feats)

    ref = _reference_forward(x, params)
    assert feats.shape == (N, F)
    # bf16 MXU operands -> ~2^-8 relative rounding on the 27-term contraction;
    # pooled error stays well below this tolerance (f32 accumulation/pool).
    assert jnp.allclose(feats, ref, atol=2e-2, rtol=2e-2), "mismatch vs reference"

    # TODO(synk): full pretrained ResNet/ViT backbone depth (and checkpoint
    # loading) is not reproduced; this kernel implements the normalize +
    # conv-stem + ReLU + global-pool feature path.
    print("KERNEL_OK")
</pallas_src>

<mosaic_0001>
module attributes {stable_mosaic.version = 11 : i64} {
  func.func @_encoder_kernel(%arg0: i32, %arg1: i32, %arg2: memref<2x256x32xbf16, #tpu.memory_space<vmem>>, %arg3: memref<32x128xbf16, #tpu.memory_space<vmem>>, %arg4: memref<1x128xf32, #tpu.memory_space<vmem>>, %arg5: memref<2x128xf32, #tpu.memory_space<vmem>>) attributes {dimension_semantics = [#tpu.dimension_semantics<parallel>, #tpu.dimension_semantics<arbitrary>], iteration_bounds = array<i64: 1, 1>, scalar_prefetch = 0 : i64, scratch_operands = 0 : i64, tpu.core_type = #tpu.core_type<tc>, window_params = [{transform_indices = @transform_0, window_bounds = array<i64: 2, 256, 32>}, {pipeline_mode = #tpu.pipeline_mode<synchronous>, transform_indices = @transform_1, window_bounds = array<i64: 32, 128>}, {pipeline_mode = #tpu.pipeline_mode<synchronous>, transform_indices = @transform_2, window_bounds = array<i64: 1, 128>}, {transform_indices = @transform_3, window_bounds = array<i64: 2, 128>}]} {
    %c0_i32 = arith.constant 0 : i32
    %0 = arith.cmpi eq, %arg1, %c0_i32 : i32
    %1 = arith.extui %0 : i1 to i32
    %c0_i32_0 = arith.constant 0 : i32
    %2 = arith.cmpi ne, %1, %c0_i32_0 : i32
    scf.if %2 {
      %cst_24 = arith.constant 0.000000e+00 : f32
      %32 = vector.broadcast %cst_24 : f32 to vector<2x128xf32>
      %c0_25 = arith.constant 0 : index
      %c0_26 = arith.constant 0 : index
      %33 = vector.load %arg5[%c0_25, %c0_26] : memref<2x128xf32, #tpu.memory_space<vmem>>, vector<2x128xf32>
      tpu.vector_store %arg5[%c0_25, %c0_26], %32 {strides = array<i32>} : memref<2x128xf32, #tpu.memory_space<vmem>>, vector<2x128xf32>,
    } else {
    }
    %c0 = arith.constant 0 : index
    %c0_1 = arith.constant 0 : index
    %c0_2 = arith.constant 0 : index
    %3 = vector.load %arg2[%c0, %c0_1, %c0_2] : memref<2x256x32xbf16, #tpu.memory_space<vmem>>, vector<1x256x32xbf16>
    %4 = vector.shape_cast %3 : vector<1x256x32xbf16> to vector<256x32xbf16>
    %c0_3 = arith.constant 0 : index
    %c0_4 = arith.constant 0 : index
    %5 = vector.load %arg3[%c0_3, %c0_4] : memref<32x128xbf16, #tpu.memory_space<vmem>>, vector<32x128xbf16>
    %cst = arith.constant dense<0.000000e+00> : vector<256x128xf32>
    %6 = tpu.matmul %4, %5, %cst {dimension_numbers = #tpu.dot_dimension_numbers<[1], [0], [0], [1], [0, 0, 1, 1], [], []>} : vector<256x32xbf16>, vector<32x128xbf16>, vector<256x128xf32> -> vector<256x128xf32>
    %c0_5 = arith.constant 0 : index
    %c0_6 = arith.constant 0 : index
    %7 = vector.load %arg4[%c0_5, %c0_6] : memref<1x128xf32, #tpu.memory_space<vmem>>, vector<1x128xf32>
    %8 = vector.broadcast %7 : vector<1x128xf32> to vector<256x128xf32>
    %9 = arith.addf %6, %8 : vector<256x128xf32>
    %cst_7 = arith.constant 0.000000e+00 : f32
    %10 = vector.broadcast %cst_7 : f32 to vector<256x128xf32>
    %11 = arith.maximumf %9, %10 : vector<256x128xf32>
    %cst_8 = arith.constant dense<0.000000e+00> : vector<128xf32>
    %12 = vector.multi_reduction <add>, %11, %cst_8 [0] : vector<256x128xf32> to vector<128xf32>
    %13 = vector.shape_cast %12 : vector<128xf32> to vector<1x128xf32>
    %c1 = arith.constant 1 : index
    %c0_9 = arith.constant 0 : index
    %c0_10 = arith.constant 0 : index
    %14 = vector.load %arg2[%c1, %c0_9, %c0_10] : memref<2x256x32xbf16, #tpu.memory_space<vmem>>, vector<1x256x32xbf16>
    %15 = vector.shape_cast %14 : vector<1x256x32xbf16> to vector<256x32xbf16>
    %c0_11 = arith.constant 0 : index
    %c0_12 = arith.constant 0 : index
    %16 = vector.load %arg3[%c0_11, %c0_12] : memref<32x128xbf16, #tpu.memory_space<vmem>>, vector<32x128xbf16>
    %cst_13 = arith.constant dense<0.000000e+00> : vector<256x128xf32>
    %17 = tpu.matmul %15, %16, %cst_13 {dimension_numbers = #tpu.dot_dimension_numbers<[1], [0], [0], [1], [0, 0, 1, 1], [], []>} : vector<256x32xbf16>, vector<32x128xbf16>, vector<256x128xf32> -> vector<256x128xf32>
    %c0_14 = arith.constant 0 : index
    %c0_15 = arith.constant 0 : index
    %18 = vector.load %arg4[%c0_14, %c0_15] : memref<1x128xf32, #tpu.memory_space<vmem>>, vector<1x128xf32>
    %19 = vector.broadcast %18 : vector<1x128xf32> to vector<256x128xf32>
    %20 = arith.addf %17, %19 : vector<256x128xf32>
    %cst_16 = arith.constant 0.000000e+00 : f32
    %21 = vector.broadcast %cst_16 : f32 to vector<256x128xf32>
    %22 = arith.maximumf %20, %21 : vector<256x128xf32>
    %cst_17 = arith.constant dense<0.000000e+00> : vector<128xf32>
    %23 = vector.multi_reduction <add>, %22, %cst_17 [0] : vector<256x128xf32> to vector<128xf32>
    %24 = vector.shape_cast %23 : vector<128xf32> to vector<1x128xf32>
    %c0_18 = arith.constant 0 : index
    %c0_19 = arith.constant 0 : index
    %25 = vector.load %arg5[%c0_18, %c0_19] : memref<2x128xf32, #tpu.memory_space<vmem>>, vector<2x128xf32>
    %26 = tpu.concatenate %13, %24 in 0 : vector<1x128xf32>, vector<1x128xf32> -> vector<2x128xf32>
    %27 = arith.addf %25, %26 : vector<2x128xf32>
    %c0_20 = arith.constant 0 : index
    %c0_21 = arith.constant 0 : index
    %28 = vector.load %arg5[%c0_20, %c0_21] : memref<2x128xf32, #tpu.memory_space<vmem>>, vector<2x128xf32>
    tpu.vector_store %arg5[%c0_20, %c0_21], %27 {strides = array<i32>} : memref<2x128xf32, #tpu.memory_space<vmem>>, vector<2x128xf32>,
    %c0_i32_22 = arith.constant 0 : i32
    %29 = arith.cmpi eq, %arg1, %c0_i32_22 : i32
    %30 = arith.extui %29 : i1 to i32
    %c0_i32_23 = arith.constant 0 : i32
    %31 = arith.cmpi ne, %30, %c0_i32_23 : i32
    scf.if %31 {
      %c0_24 = arith.constant 0 : index
      %c0_25 = arith.constant 0 : index
      %32 = vector.load %arg5[%c0_24, %c0_25] : memref<2x128xf32, #tpu.memory_space<vmem>>, vector<2x128xf32>
      %cst_26 = arith.constant 3.906250e-03 : f32
      %33 = vector.broadcast %cst_26 : f32 to vector<2x128xf32>
      %34 = arith.mulf %32, %33 : vector<2x128xf32>
      %c0_27 = arith.constant 0 : index
      %c0_28 = arith.constant 0 : index
      %35 = vector.load %arg5[%c0_27, %c0_28] : memref<2x128xf32, #tpu.memory_space<vmem>>, vector<2x128xf32>
      tpu.vector_store %arg5[%c0_27, %c0_28], %34 {strides = array<i32>} : memref<2x128xf32, #tpu.memory_space<vmem>>, vector<2x128xf32>,
    } else {
    }
    return
  }
  func.func @transform_0(%arg0: i32, %arg1: i32) -> (i32, i32, i32) {
    %c0_i32 = arith.constant 0 : i32
    %c0_i32_0 = arith.constant 0 : i32
    return %arg0, %arg1, %c0_i32 : i32, i32, i32
  }
  func.func @transform_1(%arg0: i32, %arg1: i32) -> (i32, i32) {
    %c0_i32 = arith.constant 0 : i32
    %c0_i32_0 = arith.constant 0 : i32
    %c0_i32_1 = arith.constant 0 : i32
    return %c0_i32, %c0_i32_0 : i32, i32
  }
  func.func @transform_2(%arg0: i32, %arg1: i32) -> (i32, i32) {
    %c0_i32 = arith.constant 0 : i32
    %c0_i32_0 = arith.constant 0 : i32
    %c0_i32_1 = arith.constant 0 : i32
    return %c0_i32, %c0_i32_0 : i32, i32
  }
  func.func @transform_3(%arg0: i32, %arg1: i32) -> (i32, i32) {
    %c0_i32 = arith.constant 0 : i32
    %c0_i32_0 = arith.constant 0 : i32
    return %arg0, %c0_i32 : i32, i32
  }
}

</mosaic_0001>

<bundles_post_ra>
// kernel: tpu_custom_call.1
= control target key start
LH: loop header
LB: loop body
LE: loop exit
PB: predicated region body
PF: predicated region fallthrough
CT: control target
= control target key end

     0   :  { %vm156_vm0 = vcmask 261120   ;;  %s1344_s0 = inlined_call_operand.vmem [shape: bf16[2,256,32], index: 0, kind: input, shape index: {}]   ;;  %s1345_s1 = inlined_call_operand.vmem [shape: bf16[32,128], index: 1, kind: input, shape index: {}]   ;;  %s1346_s2 = inlined_call_operand.vmem [shape: f32[1,128], index: 2, kind: input, shape index: {}]   ;;  %s1347_s3 = inlined_call_operand.hbm [shape: f32[2,128], index: 3, kind: output, shape index: {}]  }
   0x1   :  { %v1060_v0 = vld [vmem:[%s1345_s1 + $0x8] sm:$0xff]   ;;  %v1061_v1 = vld [vmem:[%s1345_s1] sm:$0xff]   ;;  %v1066_v6 = vld [vmem:[%s1344_s0 + $0x10] sm:$0xff]  }
   0x2   :  { %986 = vmatprep.subr.bf16.mxu0 %v1060_v0  ;;  %1022 = vmatprep.subr.bf16.mxu1 %v1060_v0  ;;  %v1062_v2 = vld [vmem:[%s1344_s0] sm:$0xff]   ;;  %v1064_v4 = vld [vmem:[%s1344_s0 + $0x8] sm:$0xff]   ;;  %v1067_v7 = vld [vmem:[%s1344_s0 + $0x90] sm:$0xff]  }
   0x3   :  { %987 = vmatpush3.bf16.msra.mxu0 %v1060_v0  ;;  %1023 = vmatpush3.bf16.msra.mxu1 %v1060_v0  ;;  %v1063_v3 = vld [vmem:[%s1344_s0 + $0x80] sm:$0xff]   ;;  %v1065_v5 = vld [vmem:[%s1344_s0 + $0x88] sm:$0xff]   ;;  %v1068_v8 = vld [vmem:[%s1344_s0 + $0x18] sm:$0xff]  }
   0x4   :  { %988 = vmatprep.subr.bf16.mxu0 %v1061_v1  ;;  %1024 = vmatprep.subr.bf16.mxu1 %v1061_v1  ;;  %v1069_v9 = vld [vmem:[%s1344_s0 + $0x98] sm:$0xff]   ;;  %v1070_v10 = vld [vmem:[%s1344_s0 + $0x20] sm:$0xff]   ;;  %v1072_v12 = vld [vmem:[%s1344_s0 + $0x28] sm:$0xff]  }
   0x5   :  { %990 = vmatprep.mubr.msk.bf16.mxu0 %vm156_vm0, %v1062_v2  ;;  %1026 = vmatprep.mubr.msk.bf16.mxu1 %vm156_vm0, %v1063_v3  ;;  %v1071_v11 = vld [vmem:[%s1344_s0 + $0xa0] sm:$0xff]   ;;  %v1073_v13 = vld [vmem:[%s1344_s0 + $0xa8] sm:$0xff]   ;;  %v1074_v14 = vld [vmem:[%s1344_s0 + $0x30] sm:$0xff]  }
   0x6   :  { %v1075_v15 = vld [vmem:[%s1344_s0 + $0xb0] sm:$0xff]   ;;  %v1076_v16 = vld [vmem:[%s1344_s0 + $0x38] sm:$0xff]   ;;  %v1078_v18 = vld [vmem:[%s1344_s0 + $0x40] sm:$0xff]  }
   0x7   :  { %989 = vmatpush3.bf16.msra.mxu0 %v1061_v1  ;;  %1025 = vmatpush3.bf16.msra.mxu1 %v1061_v1  ;;  %v1077_v17 = vld [vmem:[%s1344_s0 + $0xb8] sm:$0xff]   ;;  %v1079_v19 = vld [vmem:[%s1344_s0 + $0xc0] sm:$0xff]  }
   0xa   :  { %991 = vmatmul.mubr.msk.bf16.vlgmr.msra.gmra.mxu0 %vm156_vm0, %v1064_v4  ;;  %1027 = vmatmul.mubr.msk.bf16.vlgmr.msra.gmra.mxu1 %vm156_vm0, %v1065_v5 }
   0xb   :  { %994 = vmatprep.mubr.msk.bf16.mxu0 %vm156_vm0, %v1066_v6  ;;  %1030 = vmatprep.mubr.msk.bf16.mxu1 %vm156_vm0, %v1067_v7 }
  0x12   :  { %995 = vmatmul.mubr.msk.bf16.gmra.mxu0 %vm156_vm0, %v1068_v8  ;;  %1031 = vmatmul.mubr.msk.bf16.gmra.mxu1 %vm156_vm0, %v1069_v9 }
  0x13   :  { %998 = vmatprep.mubr.msk.bf16.mxu0 %vm156_vm0, %v1070_v10  ;;  %1034 = vmatprep.mubr.msk.bf16.mxu1 %vm156_vm0, %v1071_v11 }
  0x1a   :  { %999 = vmatmul.mubr.msk.bf16.gmra.mxu0 %vm156_vm0, %v1072_v12  ;;  %1035 = vmatmul.mubr.msk.bf16.gmra.mxu1 %vm156_vm0, %v1073_v13 }
  0x1b   :  { %1002 = vmatprep.mubr.msk.bf16.mxu0 %vm156_vm0, %v1074_v14  ;;  %1038 = vmatprep.mubr.msk.bf16.mxu1 %vm156_vm0, %v1075_v15 }
  0x22   :  { %1003 = vmatmul.mubr.msk.bf16.gmra.mxu0 %vm156_vm0, %v1076_v16  ;;  %1039 = vmatmul.mubr.msk.bf16.gmra.mxu1 %vm156_vm0, %v1077_v17 }
  0x23   :  { %8 = vsyncpa [#allocation3], 0  ;;  %1006 = vmatprep.mubr.msk.bf16.mxu0 %vm156_vm0, %v1078_v18  ;;  %1042 = vmatprep.mubr.msk.bf16.mxu1 %vm156_vm0, %v1079_v19  ;;  %v1080_v20 = vld [vmem:[%s1344_s0 + $0x48] sm:$0xff]   ;;  %v1082_v22 = vld [vmem:[%s1344_s0 + $0x50] sm:$0xff]   ;;  %v1116_v34 = vmov 0.0   ;;  %vm827_vm1 = vcmask 1040384  }
  0x24   :  { %v1081_v21 = vld [vmem:[%s1344_s0 + $0xc8] sm:$0xff]   ;;  %v1083_v23 = vld [vmem:[%s1344_s0 + $0xd0] sm:$0xff]   ;;  %v1084_v24 = vld [vmem:[%s1344_s0 + $0x58] sm:$0xff]   ;;  %20 = vst [vmem:[#allocation2] sm:$0x3] %v1116_v34 }
  0x25   :  { %v1085_v25 = vld [vmem:[%s1344_s0 + $0xd8] sm:$0xff]   ;;  %v1086_v26 = vld [vmem:[%s1344_s0 + $0x60] sm:$0xff]   ;;  %v1088_v28 = vld [vmem:[%s1344_s0 + $0x68] sm:$0xff]  }
  0x26   :  { %v1087_v27 = vld [vmem:[%s1344_s0 + $0xe0] sm:$0xff]   ;;  %v1089_v29 = vld [vmem:[%s1344_s0 + $0xe8] sm:$0xff]   ;;  %v1090_v30 = vld [vmem:[%s1344_s0 + $0x70] sm:$0xff]  }
  0x27   :  { %v1091_v31 = vld [vmem:[%s1344_s0 + $0xf0] sm:$0xff]   ;;  %v1092_v32 = vld [vmem:[%s1344_s0 + $0x78] sm:$0xff]   ;;  %v1275_v39 = vld [vmem:[%s1346_s2] ss:$0 sm:$0xff] }
  0x28   :  { %v1093_v33 = vld [vmem:[%s1344_s0 + $0xf8] sm:$0xff]   ;;  %s1117_s0 = smov [#allocation2]  }
  0x29   :  { %s843_s2 = sshll.u32 %s1117_s0, 4  ;;  %s844_s2 = int_to_ptr.vmem [resolvable:$true] %s843_s2 }
  0x2a   :  { %1007 = vmatmul.mubr.msk.bf16.gmra.mxu0 %vm156_vm0, %v1080_v20  ;;  %1043 = vmatmul.mubr.msk.bf16.gmra.mxu1 %vm156_vm0, %v1081_v21  ;;  %s1094_s25 = scalar_lea.vmem %s844_s2, 32  ;;  %p1099_p1 = scmp.lt.s32.totalorder %s844_s2, %s844_s2 }
  0x2b   :  { %1010 = vmatprep.mubr.msk.bf16.mxu0 %vm156_vm0, %v1082_v22  ;;  %1046 = vmatprep.mubr.msk.bf16.mxu1 %vm156_vm0, %v1083_v23  ;;  %p1095_p0 = scmp.ne.s32.totalorder %s844_s2, %s1094_s25  ;;  %p1100_p2 = scmp.lt.s32.totalorder %s1094_s25, %s1094_s25 }
  0x2d   :  { %p1101_p3 = por %p1100_p2, %p1099_p1 }
  0x2f   :  { %p1102_p4 = pnand %p1101_p3, %p1095_p0 }
  0x32   :  { %1011 = vmatmul.mubr.msk.bf16.gmra.mxu0 %vm156_vm0, %v1084_v24  ;;  %1047 = vmatmul.mubr.msk.bf16.gmra.mxu1 %vm156_vm0, %v1085_v25 }
  0x33   :  { %1014 = vmatprep.mubr.msk.bf16.mxu0 %vm156_vm0, %v1086_v26  ;;  %1050 = vmatprep.mubr.msk.bf16.mxu1 %vm156_vm0, %v1087_v27 }
  0x3a   :  { %1015 = vmatmul.mubr.msk.bf16.gmra.mxu0 %vm156_vm0, %v1088_v28  ;;  %1051 = vmatmul.mubr.msk.bf16.gmra.mxu1 %vm156_vm0, %v1089_v29 }
  0x3b   :  { %1018 = vmatprep.mubr.msk.bf16.mxu0 %vm156_vm0, %v1090_v30  ;;  %1054 = vmatprep.mubr.msk.bf16.mxu1 %vm156_vm0, %v1091_v31 }
  0x42   :  { %1019 = vmatmul.mubr.msk.bf16.gmra.mxu0 %vm156_vm0, %v1092_v32  ;;  %1055 = vmatmul.mubr.msk.bf16.gmra.mxu1 %vm156_vm0, %v1093_v33 }
  0xca   :  { %v992_v35 = vpop.f32.mrf.mxu0  ;;  %v1028_v36 = vpop.f32.mrf.mxu1 }
  0xcb   :  { %v248_v46 = vadd.f32 %v992_v35, %v1275_v39  ;;  %v639_v47 = vadd.f32 %v1028_v36, %v1275_v39 }
  0xcc   :  { %v239_v37 = vpop.f32.mrf.mxu0  ;;  %v630_v38 = vpop.f32.mrf.mxu1 }
  0xcd   :  { %v240_v40 = vadd.f32 %v1275_v39, %v239_v37  ;;  %v631_v41 = vadd.f32 %v1275_v39, %v630_v38  ;;  %v368_v60 = vmax.f32 %v248_v46, 0.0  ;;  %v759_v61 = vmax.f32 %v639_v47, 0.0 }
  0xce   :  { %v993_v42 = vpop.f32.mrf.mxu0  ;;  %v1029_v43 = vpop.f32.mrf.mxu1 }
  0xcf   :  { %v366_v50 = vmax.f32 %v240_v40, 0.0  ;;  %v757_v51 = vmax.f32 %v631_v41, 0.0  ;;  %v251_v54 = vadd.f32 %v993_v42, %v1275_v39  ;;  %v642_v55 = vadd.f32 %v1029_v43, %v1275_v39 }
  0xd0   :  { %v242_v44 = vpop.f32.mrf.mxu0  ;;  %v633_v45 = vpop.f32.mrf.mxu1 }
  0xd1   :  { %v243_v48 = vadd.f32 %v1275_v39, %v242_v44  ;;  %v634_v49 = vadd.f32 %v1275_v39, %v633_v45  ;;  %v369_v4 = vmax.f32 %v251_v54, 0.0  ;;  %v760_v5 = vmax.f32 %v642_v55, 0.0 }
  0xd2   :  { %v996_v52 = vpop.f32.mrf.mxu0  ;;  %v1032_v53 = vpop.f32.mrf.mxu1 }
  0xd3   :  { %v367_v56 = vmax.f32 %v243_v48, 0.0  ;;  %v758_v57 = vmax.f32 %v634_v49, 0.0  ;;  %v264_v8 = vadd.f32 %v996_v52, %v1275_v39  ;;  %v655_v9 = vadd.f32 %v1032_v53, %v1275_v39 }
  0xd4   :  { %v255_v58 = vpop.f32.mrf.mxu0  ;;  %v646_v59 = vpop.f32.mrf.mxu1 }
  0xd5   :  { %v398_v62 = vadd.f32 %v367_v56, %v366_v50  ;;  %v789_v63 = vadd.f32 %v758_v57, %v757_v51  ;;  %v256_v0 = vadd.f32 %v1275_v39, %v255_v58  ;;  %v647_v1 = vadd.f32 %v1275_v39, %v646_v59 }
  0xd6   :  { %v997_v2 = vpop.f32.mrf.mxu0  ;;  %v1033_v3 = vpop.f32.mrf.mxu1  ;;  %v372_v28 = vmax.f32 %v264_v8, 0.0  ;;  %v763_v29 = vmax.f32 %v655_v9, 0.0 }
  0xd7   :  { %v399_v6 = vadd.f32 %v398_v62, %v368_v60  ;;  %v790_v7 = vadd.f32 %v789_v63, %v759_v61  ;;  %v370_v12 = vmax.f32 %v256_v0, 0.0  ;;  %v761_v14 = vmax.f32 %v647_v1, 0.0 }
  0xd8   :  { %v258_v10 = vpop.f32.mrf.mxu0  ;;  %v649_v11 = vpop.f32.mrf.mxu1  ;;  %v267_v22 = vadd.f32 %v997_v2, %v1275_v39  ;;  %v658_v23 = vadd.f32 %v1033_v3, %v1275_v39 }
  0xd9   :  { %v400_v13 = vadd.f32 %v399_v6, %v369_v4  ;;  %v791_v15 = vadd.f32 %v790_v7, %v760_v5  ;;  %v259_v16 = vadd.f32 %v1275_v39, %v258_v10  ;;  %v650_v17 = vadd.f32 %v1275_v39, %v649_v11 }
  0xda   :  { %v1000_v18 = vpop.f32.mrf.mxu0  ;;  %v1036_v19 = vpop.f32.mrf.mxu1  ;;  %v373_v36 = vmax.f32 %v267_v22, 0.0  ;;  %v764_v37 = vmax.f32 %v658_v23, 0.0 }
  0xdb   :  { %v401_v20 = vadd.f32 %v400_v13, %v370_v12  ;;  %v792_v21 = vadd.f32 %v791_v15, %v761_v14  ;;  %v371_v24 = vmax.f32 %v259_v16, 0.0  ;;  %v762_v25 = vmax.f32 %v650_v17, 0.0 }
  0xdc   :  { %v271_v26 = vpop.f32.mrf.mxu0  ;;  %v662_v27 = vpop.f32.mrf.mxu1  ;;  %v280_v43 = vadd.f32 %v1000_v18, %v1275_v39  ;;  %v671_v44 = vadd.f32 %v1036_v19, %v1275_v39 }
  0xdd   :  { %v402_v30 = vadd.f32 %v401_v20, %v371_v24  ;;  %v793_v31 = vadd.f32 %v792_v21, %v762_v25  ;;  %v272_v32 = vadd.f32 %v1275_v39, %v271_v26  ;;  %v663_v33 = vadd.f32 %v1275_v39, %v662_v27 }
  0xde   :  { %v1001_v34 = vpop.f32.mrf.mxu0  ;;  %v1037_v35 = vpop.f32.mrf.mxu1  ;;  %v376_v61 = vmax.f32 %v280_v43, 0.0  ;;  %v767_v62 = vmax.f32 %v671_v44, 0.0 }
  0xdf   :  { %v403_v38 = vadd.f32 %v402_v30, %v372_v28  ;;  %v794_v40 = vadd.f32 %v793_v31, %v763_v29  ;;  %v374_v47 = vmax.f32 %v272_v32, 0.0  ;;  %v765_v49 = vmax.f32 %v663_v33, 0.0 }
  0xe0   :  { %v274_v41 = vpop.f32.mrf.mxu0  ;;  %v665_v42 = vpop.f32.mrf.mxu1  ;;  %v283_v57 = vadd.f32 %v1001_v34, %v1275_v39  ;;  %v674_v58 = vadd.f32 %v1037_v35, %v1275_v39 }
  0xe1   :  { %v275_v45 = vadd.f32 %v1275_v39, %v274_v41  ;;  %v666_v46 = vadd.f32 %v1275_v39, %v665_v42  ;;  %v404_v48 = vadd.f32 %v403_v38, %v373_v36  ;;  %v795_v50 = vadd.f32 %v794_v40, %v764_v37 }
  0xe2   :  { %v1004_v51 = vpop.f32.mrf.mxu0  ;;  %v1040_v52 = vpop.f32.mrf.mxu1  ;;  %v377_v5 = vmax.f32 %v283_v57, 0.0  ;;  %v768_v6 = vmax.f32 %v674_v58, 0.0 }
  0xe3   :  { %v375_v53 = vmax.f32 %v275_v45, 0.0  ;;  %v766_v54 = vmax.f32 %v666_v46, 0.0  ;;  %v405_v55 = vadd.f32 %v404_v48, %v374_v47  ;;  %v796_v56 = vadd.f32 %v795_v50, %v765_v49 }
  0xe4   :  { %v287_v59 = vpop.f32.mrf.mxu0  ;;  %v678_v60 = vpop.f32.mrf.mxu1  ;;  %v296_v11 = vadd.f32 %v1004_v51, %v1275_v39  ;;  %v687_v12 = vadd.f32 %v1040_v52, %v1275_v39 }
  0xe5   :  { %v406_v63 = vadd.f32 %v405_v55, %v375_v53  ;;  %v797_v0 = vadd.f32 %v796_v56, %v766_v54  ;;  %v288_v1 = vadd.f32 %v1275_v39, %v287_v59  ;;  %v679_v2 = vadd.f32 %v1275_v39, %v678_v60 }
  0xe6   :  { %v1005_v3 = vpop.f32.mrf.mxu0  ;;  %v1041_v4 = vpop.f32.mrf.mxu1  ;;  %v380_v29 = vmax.f32 %v296_v11, 0.0  ;;  %v771_v30 = vmax.f32 %v687_v12, 0.0 }
  0xe7   :  { %v407_v7 = vadd.f32 %v406_v63, %v376_v61  ;;  %v798_v8 = vadd.f32 %v797_v0, %v767_v62  ;;  %v378_v15 = vmax.f32 %v288_v1, 0.0  ;;  %v769_v17 = vmax.f32 %v679_v2, 0.0 }
  0xe8   :  { %v290_v9 = vpop.f32.mrf.mxu0  ;;  %v681_v10 = vpop.f32.mrf.mxu1  ;;  %v299_v25 = vadd.f32 %v1005_v3, %v1275_v39  ;;  %v690_v26 = vadd.f32 %v1041_v4, %v1275_v39 }
  0xe9   :  { %v291_v13 = vadd.f32 %v1275_v39, %v290_v9  ;;  %v682_v14 = vadd.f32 %v1275_v39, %v681_v10  ;;  %v408_v16 = vadd.f32 %v407_v7, %v377_v5  ;;  %v799_v18 = vadd.f32 %v798_v8, %v768_v6 }
  0xea   :  { %v1008_v19 = vpop.f32.mrf.mxu0  ;;  %v1044_v20 = vpop.f32.mrf.mxu1  ;;  %v381_v37 = vmax.f32 %v299_v25, 0.0  ;;  %v772_v38 = vmax.f32 %v690_v26, 0.0 }
  0xeb   :  { %v379_v21 = vmax.f32 %v291_v13, 0.0  ;;  %v770_v22 = vmax.f32 %v682_v14, 0.0  ;;  %v409_v23 = vadd.f32 %v408_v16, %v378_v15  ;;  %v800_v24 = vadd.f32 %v799_v18, %v769_v17 }
  0xec   :  { %v303_v27 = vpop.f32.mrf.mxu0  ;;  %v694_v28 = vpop.f32.mrf.mxu1  ;;  %v312_v44 = vadd.f32 %v1008_v19, %v1275_v39  ;;  %v703_v45 = vadd.f32 %v1044_v20, %v1275_v39 }
  0xed   :  { %v410_v31 = vadd.f32 %v409_v23, %v379_v21  ;;  %v801_v32 = vadd.f32 %v800_v24, %v770_v22  ;;  %v304_v33 = vadd.f32 %v1275_v39, %v303_v27  ;;  %v695_v34 = vadd.f32 %v1275_v39, %v694_v28 }
  0xee   :  { %v1009_v35 = vpop.f32.mrf.mxu0  ;;  %v1045_v36 = vpop.f32.mrf.mxu1  ;;  %v384_v62 = vmax.f32 %v312_v44, 0.0  ;;  %v775_v63 = vmax.f32 %v703_v45, 0.0 }
  0xef   :  { %v411_v40 = vadd.f32 %v410_v31, %v380_v29  ;;  %v802_v41 = vadd.f32 %v801_v32, %v771_v30  ;;  %v382_v48 = vmax.f32 %v304_v33, 0.0  ;;  %v773_v50 = vmax.f32 %v695_v34, 0.0 }
  0xf0   :  { %v306_v42 = vpop.f32.mrf.mxu0  ;;  %v697_v43 = vpop.f32.mrf.mxu1  ;;  %v315_v58 = vadd.f32 %v1009_v35, %v1275_v39  ;;  %v706_v59 = vadd.f32 %v1045_v36, %v1275_v39 }
  0xf1   :  { %v307_v46 = vadd.f32 %v1275_v39, %v306_v42  ;;  %v698_v47 = vadd.f32 %v1275_v39, %v697_v43  ;;  %v412_v49 = vadd.f32 %v411_v40, %v381_v37  ;;  %v803_v51 = vadd.f32 %v802_v41, %v772_v38 }
  0xf2   :  { %v1012_v52 = vpop.f32.mrf.mxu0  ;;  %v1048_v53 = vpop.f32.mrf.mxu1  ;;  %v385_v6 = vmax.f32 %v315_v58, 0.0  ;;  %v776_v7 = vmax.f32 %v706_v59, 0.0 }
  0xf3   :  { %v383_v54 = vmax.f32 %v307_v46, 0.0  ;;  %v774_v55 = vmax.f32 %v698_v47, 0.0  ;;  %v413_v56 = vadd.f32 %v412_v49, %v382_v48  ;;  %v804_v57 = vadd.f32 %v803_v51, %v773_v50 }
  0xf4   :  { %v319_v60 = vpop.f32.mrf.mxu0  ;;  %v710_v61 = vpop.f32.mrf.mxu1  ;;  %v328_v12 = vadd.f32 %v1012_v52, %v1275_v39  ;;  %v719_v13 = vadd.f32 %v1048_v53, %v1275_v39 }
  0xf5   :  { %v414_v0 = vadd.f32 %v413_v56, %v383_v54  ;;  %v805_v1 = vadd.f32 %v804_v57, %v774_v55  ;;  %v320_v2 = vadd.f32 %v1275_v39, %v319_v60  ;;  %v711_v3 = vadd.f32 %v1275_v39, %v710_v61 }
  0xf6   :  { %v1013_v4 = vpop.f32.mrf.mxu0  ;;  %v1049_v5 = vpop.f32.mrf.mxu1  ;;  %v388_v30 = vmax.f32 %v328_v12, 0.0  ;;  %v779_v31 = vmax.f32 %v719_v13, 0.0 }
  0xf7   :  { %v415_v8 = vadd.f32 %v414_v0, %v384_v62  ;;  %v806_v9 = vadd.f32 %v805_v1, %v775_v63  ;;  %v386_v16 = vmax.f32 %v320_v2, 0.0  ;;  %v777_v18 = vmax.f32 %v711_v3, 0.0 }
  0xf8   :  { %v322_v10 = vpop.f32.mrf.mxu0  ;;  %v713_v11 = vpop.f32.mrf.mxu1  ;;  %v331_v26 = vadd.f32 %v1013_v4, %v1275_v39  ;;  %v722_v27 = vadd.f32 %v1049_v5, %v1275_v39 }
  0xf9   :  { %v323_v14 = vadd.f32 %v1275_v39, %v322_v10  ;;  %v714_v15 = vadd.f32 %v1275_v39, %v713_v11  ;;  %v416_v17 = vadd.f32 %v415_v8, %v385_v6  ;;  %v807_v19 = vadd.f32 %v806_v9, %v776_v7 }
  0xfa   :  { %v1016_v20 = vpop.f32.mrf.mxu0  ;;  %v1052_v21 = vpop.f32.mrf.mxu1  ;;  %v389_v38 = vmax.f32 %v331_v26, 0.0  ;;  %v780_v40 = vmax.f32 %v722_v27, 0.0 }
  0xfb   :  { %v387_v22 = vmax.f32 %v323_v14, 0.0  ;;  %v778_v23 = vmax.f32 %v714_v15, 0.0  ;;  %v417_v24 = vadd.f32 %v416_v17, %v386_v16  ;;  %v808_v25 = vadd.f32 %v807_v19, %v777_v18 }
  0xfc   :  { %v335_v28 = vpop.f32.mrf.mxu0  ;;  %v726_v29 = vpop.f32.mrf.mxu1  ;;  %v344_v45 = vadd.f32 %v1016_v20, %v1275_v39  ;;  %v735_v46 = vadd.f32 %v1052_v21, %v1275_v39 }
  0xfd   :  { %v418_v32 = vadd.f32 %v417_v24, %v387_v22  ;;  %v809_v33 = vadd.f32 %v808_v25, %v778_v23  ;;  %v336_v34 = vadd.f32 %v1275_v39, %v335_v28  ;;  %v727_v35 = vadd.f32 %v1275_v39, %v726_v29 }
  0xfe   :  { %v1017_v36 = vpop.f32.mrf.mxu0  ;;  %v1053_v37 = vpop.f32.mrf.mxu1  ;;  %v392_v63 = vmax.f32 %v344_v45, 0.0  ;;  %v783_v0 = vmax.f32 %v735_v46, 0.0 }
  0xff   :  { %v419_v41 = vadd.f32 %v418_v32, %v388_v30  ;;  %v810_v42 = vadd.f32 %v809_v33, %v779_v31  ;;  %v390_v49 = vmax.f32 %v336_v34, 0.0  ;;  %v781_v51 = vmax.f32 %v727_v35, 0.0 }
 0x100   :  { %v338_v43 = vpop.f32.mrf.mxu0  ;;  %v729_v44 = vpop.f32.mrf.mxu1  ;;  %v347_v59 = vadd.f32 %v1017_v36, %v1275_v39  ;;  %v738_v60 = vadd.f32 %v1053_v37, %v1275_v39 }
 0x101   :  { %v339_v47 = vadd.f32 %v1275_v39, %v338_v43  ;;  %v730_v48 = vadd.f32 %v1275_v39, %v729_v44  ;;  %v420_v50 = vadd.f32 %v419_v41, %v389_v38  ;;  %v811_v52 = vadd.f32 %v810_v42, %v780_v40 }
 0x102   :  { %v1020_v53 = vpop.f32.mrf.mxu0  ;;  %v1056_v54 = vpop.f32.mrf.mxu1  ;;  %v393_v7 = vmax.f32 %v347_v59, 0.0  ;;  %v784_v8 = vmax.f32 %v738_v60, 0.0 }
 0x103   :  { %v391_v55 = vmax.f32 %v339_v47, 0.0  ;;  %v782_v56 = vmax.f32 %v730_v48, 0.0  ;;  %v421_v57 = vadd.f32 %v420_v50, %v390_v49  ;;  %v812_v58 = vadd.f32 %v811_v52, %v781_v51  ;;  %v826_v49 = vld [vmem:[#allocation2] sm:$0x3] }
 0x104   :  { %v351_v61 = vpop.f32.mrf.mxu0  ;;  %v742_v62 = vpop.f32.mrf.mxu1  ;;  %v360_v13 = vadd.f32 %v1020_v53, %v1275_v39  ;;  %v751_v14 = vadd.f32 %v1056_v54, %v1275_v39 }
 0x105   :  { %v422_v1 = vadd.f32 %v421_v57, %v391_v55  ;;  %v813_v2 = vadd.f32 %v812_v58, %v782_v56  ;;  %v352_v3 = vadd.f32 %v1275_v39, %v351_v61  ;;  %v743_v4 = vadd.f32 %v1275_v39, %v742_v62 }
 0x106   :  { %v1021_v5 = vpop.f32.mrf.mxu0  ;;  %v1057_v6 = vpop.f32.mrf.mxu1  ;;  %v396_v27 = vmax.f32 %v360_v13, 0.0  ;;  %v787_v28 = vmax.f32 %v751_v14, 0.0 }
 0x107   :  { %v423_v9 = vadd.f32 %v422_v1, %v392_v63  ;;  %v814_v10 = vadd.f32 %v813_v2, %v783_v0  ;;  %v394_v17 = vmax.f32 %v352_v3, 0.0  ;;  %v785_v19 = vmax.f32 %v743_v4, 0.0 }
 0x108   :  { %v354_v11 = vpop.f32.mrf.mxu0  ;;  %v745_v12 = vpop.f32.mrf.mxu1  ;;  %v363_v25 = vadd.f32 %v1021_v5, %v1275_v39  ;;  %v754_v26 = vadd.f32 %v1057_v6, %v1275_v39 }
 0x109   :  { %v355_v15 = vadd.f32 %v1275_v39, %v354_v11  ;;  %v746_v16 = vadd.f32 %v1275_v39, %v745_v12  ;;  %v424_v18 = vadd.f32 %v423_v9, %v393_v7  ;;  %v815_v20 = vadd.f32 %v814_v10, %v784_v8 }
 0x10a   :  { %v397_v31 = vmax.f32 %v363_v25, 0.0  ;;  %v788_v32 = vmax.f32 %v754_v26, 0.0 }
 0x10b   :  { %v395_v21 = vmax.f32 %v355_v15, 0.0  ;;  %v786_v22 = vmax.f32 %v746_v16, 0.0  ;;  %v425_v23 = vadd.f32 %v424_v18, %v394_v17  ;;  %v816_v24 = vadd.f32 %v815_v20, %v785_v19 }
 0x10d   :  { %v426_v29 = vadd.f32 %v425_v23, %v395_v21  ;;  %v817_v30 = vadd.f32 %v816_v24, %v786_v22 }
 0x10f   :  { %v427_v33 = vadd.f32 %v426_v29, %v396_v27  ;;  %v818_v34 = vadd.f32 %v817_v30, %v787_v28 }
 0x111   :  { %v428_v35 = vadd.f32 %v427_v33, %v397_v31  ;;  %v819_v36 = vadd.f32 %v818_v34, %v788_v32 }
 0x113   :  { %v429_v37 = vrot.slane %v428_v35, 4  ;;  %v820_v38 = vrot.slane %v819_v36, 4 }
 0x115   :  { %v430_v40 = vadd.f32 %v429_v37, %v428_v35  ;;  %v821_v41 = vadd.f32 %v820_v38, %v819_v36 }
 0x117   :  { %v431_v42 = vrot.slane %v430_v40, 2  ;;  %v822_v43 = vrot.slane %v821_v41, 2 }
 0x119   :  { %v432_v44 = vadd.f32 %v431_v42, %v430_v40  ;;  %v823_v45 = vadd.f32 %v822_v43, %v821_v41 }
 0x11b   :  { %v433_v46 = vrot.slane %v432_v44, 1  ;;  %v824_v39 = vrot.slane %v823_v45, 1 }
 0x11d   :  { %v434_v47 = vadd.f32 %v433_v46, %v432_v44  ;;  %v825_v48 = vadd.f32 %v824_v39, %v823_v45 }
 0x11f   :  { %v828_v50 = vsel %vm827_vm1, %v434_v47, %v825_v48 }
 0x120   :  { %v829_v51 = vadd.f32 %v828_v50, %v826_v49 }
 0x122   :  { %830 = vst [vmem:[#allocation2] sm:$0x3] %v829_v51 }
 0x129   :  { %v834_v52 = vld [vmem:[#allocation2] sm:$0x3] }
 0x12a   :  { %v835_v53 = vmul.f32 0.00390625, %v834_v52 }
 0x12c   :  { %836 = vst [vmem:[#allocation2] sm:$0x3] %v835_v53 }
 0x12d   :  { %1105 = shalt.err (!%p1102_p4)
}
 0x12e   :  { %846 = dma.vmem_to_hbm [thread:$0]  %s844_s2, 32, %s1347_s3, [#allocation3]  }
 0x12f   :  { %1114 = dma.done.wait [#allocation3], 32  }
 0x130   :  { %1115 = vsyncadd [#allocation3], 4294967264 }
 0x131   :  { %850 = vsyncpa [#allocation3], 1 }

</bundles_post_ra>
